<compile_context>
chip_gen: v5e
topology: v5e:2x2
jax: 0.10.0
libtpu: 0.0.40
codegen_flags: <defaults>
</compile_context>

<pallas_src>
import functools
import math

import jax
import jax.numpy as jnp
from jax.experimental import pallas as pl
from jax.experimental.pallas import tpu as pltpu

# ---- small test shapes, consistent with the module ----
BATCH = 2
SEQ = 8
HIDDEN = 32
HEADS = 4

_NEG_INF = jnp.float32(-1e30)  # additive mask for cross-batch score entries


def mha_kernel(x_ref, mask_ref, wqkv_ref, bqkv_ref, wo_ref, bo_ref, out_ref, *, heads):
    """Whole multi-head attention in one grid step.

    Block views (full arrays, single grid step):
      x      : (N, 3H)   N = batch*seq tokens, features = [query | key | value]
      mask   : (N, N)    additive mask: vm inside a batch, -1e30 across batches
      wqkv   : (3H, 3H)  block-diagonal fused projection (pre-transposed: x @ W)
      bqkv   : (1, 3H)
      wo, bo : (H, H), (1, H)
      out    : (N, H)
    """
    n_tok, three_h = x_ref.shape
    hidden = three_h // 3
    per_head = hidden // heads
    scale = 1.0 / math.sqrt(float(per_head))

    # ---- fused Q/K/V projection: a single MXU matmul, fp32 accumulation ----
    qkv = jnp.dot(x_ref[...], wqkv_ref[...],
                  preferred_element_type=jnp.float32) + bqkv_ref[0]      # (N, 3H)

    # ---- move to feature-major layout ----
    # One 2-D transpose puts features on the sublane axis, so the per-head
    # split below is a tile-aligned sublane reshape (no 128-lane slicing, no
    # per-head transposes, no concat).
    qkv_t = qkv.T                                                        # (3H, N)
    q_t = qkv_t[:hidden, :] * scale          # scale applied once to Q   # (H, N)
    k_t = qkv_t[hidden:2 * hidden, :]
    v_t = qkv_t[2 * hidden:, :]

    q3 = q_t.reshape(heads, per_head, n_tok)                             # (h, d, n)
    k3 = k_t.reshape(heads, per_head, n_tok)                             # (h, d, m)
    v3 = v_t.reshape(heads, per_head, n_tok)                             # (h, d, m)

    # ---- scores: batched over heads (no per-head Python loop) ----
    q_hm = jnp.swapaxes(q3, 1, 2)                                        # (h, n, d)
    scores = jnp.einsum("hnd,hdm->hnm", q_hm, k3,
                        preferred_element_type=jnp.float32)              # (h, n, m)
    scores = scores + mask_ref[...]          # (N,N) broadcasts over heads

    # ---- softmax in fp32 (max-subtracted); exact divide keeps 1e-5 parity ----
    m = jnp.max(scores, axis=-1, keepdims=True)
    e = jnp.exp(scores - m)
    probs = e / jnp.sum(e, axis=-1, keepdims=True)

    # ---- context: contract over key tokens, batched over heads ----
    ctx_t = jnp.einsum("hdm,hnm->hdn", v3, probs,
                       preferred_element_type=jnp.float32)               # (h, d, n)
    # "unshape": back to token-major, heads concatenated along the feature axis.
    ctx = ctx_t.reshape(hidden, n_tok).T                                 # (N, H)

    # ---- output projection ----
    out = jnp.dot(ctx, wo_ref[...],
                  preferred_element_type=jnp.float32) + bo_ref[0]        # (N, H)
    out_ref[...] = out.astype(out_ref.dtype)


@functools.partial(jax.jit, static_argnames=("heads_num",))
def multi_headed_attention(key, value, query, vm, fused_params, *, heads_num):
    """fused_params: dict with w_qkv (3H,3H) block-diag, b_qkv (1,3H), wo (H,H), bo (1,H).

    Weights are stored pre-transposed as (in, out), so the kernel computes
    x @ W + b, equivalent to PyTorch nn.Linear's x @ W.T + b.
    """
    B, S, H = key.shape
    assert H % heads_num == 0, "hidden_size must be divisible by heads_num"
    N = B * S

    # Concatenate the three (possibly distinct) inputs along the feature axis;
    # together with the block-diagonal fused weight this makes the QKV
    # projection a single matmul inside the kernel.
    x = jnp.concatenate([query, key, value], axis=-1).reshape(N, 3 * H)

    # Combined additive score mask: vm inside each batch element, -1e30 for
    # cross-batch pairs (those positions get exactly-zero softmax weight, so
    # collapsing the batch into one token axis is exact).
    if vm is None:
        vm_blocks = jnp.zeros((B, S, S), jnp.float32)
    else:
        vm_blocks = vm[:, 0].astype(jnp.float32)                     # (B, S, S)
    same_batch = jnp.arange(B)[:, None] == jnp.arange(B)[None, :]    # (B, B)
    mask = jnp.where(same_batch[:, None, :, None],
                     vm_blocks[:, :, None, :],
                     _NEG_INF).reshape(N, N)

    kernel = functools.partial(mha_kernel, heads=heads_num)

    out = pl.pallas_call(
        kernel,
        out_shape=jax.ShapeDtypeStruct((N, H), jnp.float32),
        # Single grid step: whole problem (< 100 KiB) lives in VMEM at once;
        # weights and activations are DMA'd exactly once.
        grid=(1,),
        in_specs=[
            pl.BlockSpec((N, 3 * H), lambda i: (0, 0)),        # x
            pl.BlockSpec((N, N), lambda i: (0, 0)),            # mask
            pl.BlockSpec((3 * H, 3 * H), lambda i: (0, 0)),    # w_qkv
            pl.BlockSpec((1, 3 * H), lambda i: (0, 0)),        # b_qkv
            pl.BlockSpec((H, H), lambda i: (0, 0)),            # wo
            pl.BlockSpec((1, H), lambda i: (0, 0)),            # bo
        ],
        out_specs=pl.BlockSpec((N, H), lambda i: (0, 0)),
        compiler_params=pltpu.CompilerParams(dimension_semantics=("arbitrary",)),
    )(x, mask, fused_params["w_qkv"], fused_params["b_qkv"],
      fused_params["wo"], fused_params["bo"])

    return out.reshape(B, S, H)


def fuse_params(params, hidden):
    """Build the block-diagonal fused QKV weight/bias (done once, at setup time)."""
    h = hidden
    w_qkv = jnp.zeros((3 * h, 3 * h), jnp.float32)
    w_qkv = w_qkv.at[:h, :h].set(params["wq"])
    w_qkv = w_qkv.at[h:2 * h, h:2 * h].set(params["wk"])
    w_qkv = w_qkv.at[2 * h:, 2 * h:].set(params["wv"])
    b_qkv = jnp.concatenate([params["bq"], params["bk"], params["bv"]], axis=-1)
    return {"w_qkv": w_qkv, "b_qkv": b_qkv, "wo": params["wo"], "bo": params["bo"]}


def reference(key, value, query, vm, params, heads):
    """Pure-JAX reference matching the PyTorch forward exactly."""
    B, S, H = key.shape
    per_head = H // heads
    q = query @ params["wq"] + params["bq"][0]
    k = key @ params["wk"] + params["bk"][0]
    v = value @ params["wv"] + params["bv"][0]

    def shape(x):
        return x.reshape(B, S, heads, per_head).transpose(0, 2, 1, 3)

    qh, kh, vh = shape(q), shape(k), shape(v)
    scores = jnp.einsum("bhqd,bhkd->bhqk", qh, kh) / math.sqrt(float(per_head))
    if vm is not None:
        scores = scores + vm
    probs = jax.nn.softmax(scores, axis=-1)
    ctx = jnp.einsum("bhqk,bhkd->bhqd", probs, vh)
    ctx = ctx.transpose(0, 2, 1, 3).reshape(B, S, H)
    return ctx @ params["wo"] + params["bo"][0]


if __name__ == "__main__":
    root = jax.random.PRNGKey(0)
    keys = jax.random.split(root, 12)

    # nn.Linear(hidden, hidden)-shaped params, stored pre-transposed as (in, out).
    scale = 0.05
    params = {
        "wq": scale * jax.random.normal(keys[0], (HIDDEN, HIDDEN), jnp.float32),
        "bq": scale * jax.random.normal(keys[1], (1, HIDDEN), jnp.float32),
        "wk": scale * jax.random.normal(keys[2], (HIDDEN, HIDDEN), jnp.float32),
        "bk": scale * jax.random.normal(keys[3], (1, HIDDEN), jnp.float32),
        "wv": scale * jax.random.normal(keys[4], (HIDDEN, HIDDEN), jnp.float32),
        "bv": scale * jax.random.normal(keys[5], (1, HIDDEN), jnp.float32),
        "wo": scale * jax.random.normal(keys[6], (HIDDEN, HIDDEN), jnp.float32),
        "bo": scale * jax.random.normal(keys[7], (1, HIDDEN), jnp.float32),
    }
    fused = fuse_params(params, HIDDEN)

    key_in = jax.random.normal(keys[8], (BATCH, SEQ, HIDDEN), jnp.float32)
    value_in = jax.random.normal(keys[9], (BATCH, SEQ, HIDDEN), jnp.float32)
    query_in = jax.random.normal(keys[10], (BATCH, SEQ, HIDDEN), jnp.float32)
    # Additive visibility-matrix mask [B, 1, S, S].
    vm_in = 0.1 * jax.random.normal(keys[11], (BATCH, 1, SEQ, SEQ), jnp.float32)

    out = multi_headed_attention(key_in, value_in, query_in, vm_in, fused,
                                 heads_num=HEADS)
    out = jax.block_until_ready(out)

    ref = reference(key_in, value_in, query_in, vm_in, params, HEADS)
    assert out.shape == (BATCH, SEQ, HIDDEN)
    assert jnp.allclose(out, ref, atol=1e-5, rtol=1e-5), "mismatch vs reference"

    print("KERNEL_OK")
</pallas_src>

<mosaic_0001>
module attributes {stable_mosaic.version = 11 : i64} {
  func.func @mha_kernel(%arg0: i32, %arg1: memref<16x96xf32, #tpu.memory_space<vmem>>, %arg2: memref<16x16xf32, #tpu.memory_space<vmem>>, %arg3: memref<96x96xf32, #tpu.memory_space<vmem>>, %arg4: memref<1x96xf32, #tpu.memory_space<vmem>>, %arg5: memref<32x32xf32, #tpu.memory_space<vmem>>, %arg6: memref<1x32xf32, #tpu.memory_space<vmem>>, %arg7: memref<16x32xf32, #tpu.memory_space<vmem>>) attributes {dimension_semantics = [#tpu.dimension_semantics<arbitrary>], iteration_bounds = array<i64: 1>, scalar_prefetch = 0 : i64, scratch_operands = 0 : i64, tpu.core_type = #tpu.core_type<tc>, window_params = [{pipeline_mode = #tpu.pipeline_mode<synchronous>, transform_indices = @transform_0, window_bounds = array<i64: 16, 96>}, {pipeline_mode = #tpu.pipeline_mode<synchronous>, transform_indices = @transform_1, window_bounds = array<i64: 16, 16>}, {pipeline_mode = #tpu.pipeline_mode<synchronous>, transform_indices = @transform_2, window_bounds = array<i64: 96, 96>}, {pipeline_mode = #tpu.pipeline_mode<synchronous>, transform_indices = @transform_3, window_bounds = array<i64: 1, 96>}, {pipeline_mode = #tpu.pipeline_mode<synchronous>, transform_indices = @transform_4, window_bounds = array<i64: 32, 32>}, {pipeline_mode = #tpu.pipeline_mode<synchronous>, transform_indices = @transform_5, window_bounds = array<i64: 1, 32>}, {pipeline_mode = #tpu.pipeline_mode<synchronous>, transform_indices = @transform_6, window_bounds = array<i64: 16, 32>}]} {
    %c0 = arith.constant 0 : index
    %c0_0 = arith.constant 0 : index
    %0 = vector.load %arg1[%c0, %c0_0] : memref<16x96xf32, #tpu.memory_space<vmem>>, vector<16x96xf32>
    %c0_1 = arith.constant 0 : index
    %c0_2 = arith.constant 0 : index
    %1 = vector.load %arg3[%c0_1, %c0_2] : memref<96x96xf32, #tpu.memory_space<vmem>>, vector<96x96xf32>
    %cst = arith.constant dense<0.000000e+00> : vector<16x96xf32>
    %2 = tpu.matmul %0, %1, %cst {dimension_numbers = #tpu.dot_dimension_numbers<[1], [0], [0], [1], [0, 0, 1, 1], [], []>} : vector<16x96xf32>, vector<96x96xf32>, vector<16x96xf32> -> vector<16x96xf32>
    %c0_3 = arith.constant 0 : index
    %c0_4 = arith.constant 0 : index
    %3 = vector.load %arg4[%c0_3, %c0_4] : memref<1x96xf32, #tpu.memory_space<vmem>>, vector<1x96xf32>
    %4 = vector.shape_cast %3 : vector<1x96xf32> to vector<96xf32>
    %5 = vector.shape_cast %4 : vector<96xf32> to vector<1x96xf32>
    %6 = vector.broadcast %5 : vector<1x96xf32> to vector<16x96xf32>
    %7 = arith.addf %2, %6 : vector<16x96xf32>
    %8 = tpu.transpose %7, [1, 0] : vector<16x96xf32> -> vector<96x16xf32>
    %9 = vector.extract_strided_slice %8 {offsets = [0, 0], sizes = [32, 16], strides = [1, 1]} : vector<96x16xf32> to vector<32x16xf32>
    %cst_5 = arith.constant 0.353553385 : f32
    %10 = vector.broadcast %cst_5 : f32 to vector<32x16xf32>
    %11 = arith.mulf %9, %10 : vector<32x16xf32>
    %12 = vector.extract_strided_slice %8 {offsets = [32, 0], sizes = [32, 16], strides = [1, 1]} : vector<96x16xf32> to vector<32x16xf32>
    %13 = vector.extract_strided_slice %8 {offsets = [64, 0], sizes = [32, 16], strides = [1, 1]} : vector<96x16xf32> to vector<32x16xf32>
    %14 = vector.shape_cast %11 : vector<32x16xf32> to vector<4x8x16xf32>
    %15 = vector.shape_cast %12 : vector<32x16xf32> to vector<4x8x16xf32>
    %16 = vector.shape_cast %13 : vector<32x16xf32> to vector<4x8x16xf32>
    %17 = tpu.transpose %14, [0, 2, 1] : vector<4x8x16xf32> -> vector<4x16x8xf32>
    "tpu.trace_start"() <{level = 10 : i32, message = "hnd,hdm->hnm"}> : () -> ()
    %cst_6 = arith.constant dense<0.000000e+00> : vector<4x16x16xf32>
    %18 = tpu.matmul %17, %15, %cst_6 {dimension_numbers = #tpu.dot_dimension_numbers<[2], [1], [1], [2], [0, 0, 0, 1, 1, 2], [0], [0]>} : vector<4x16x8xf32>, vector<4x8x16xf32>, vector<4x16x16xf32> -> vector<4x16x16xf32>
    "tpu.trace_stop"() : () -> ()
    %c0_7 = arith.constant 0 : index
    %c0_8 = arith.constant 0 : index
    %19 = vector.load %arg2[%c0_7, %c0_8] : memref<16x16xf32, #tpu.memory_space<vmem>>, vector<16x16xf32>
    %20 = vector.shape_cast %19 : vector<16x16xf32> to vector<1x16x16xf32>
    %21 = vector.broadcast %20 : vector<1x16x16xf32> to vector<4x16x16xf32>
    %22 = arith.addf %18, %21 : vector<4x16x16xf32>
    %cst_9 = arith.constant dense<0xFF800000> : vector<4x16xf32>
    %23 = vector.multi_reduction <maximumf>, %22, %cst_9 [2] : vector<4x16x16xf32> to vector<4x16xf32>
    %24 = vector.shape_cast %23 : vector<4x16xf32> to vector<4x16x1xf32>
    %25 = vector.broadcast %24 : vector<4x16x1xf32> to vector<4x16x16xf32>
    %26 = arith.subf %22, %25 : vector<4x16x16xf32>
    %27 = math.exp %26 : vector<4x16x16xf32>
    %cst_10 = arith.constant dense<0.000000e+00> : vector<4x16xf32>
    %28 = vector.multi_reduction <add>, %27, %cst_10 [2] : vector<4x16x16xf32> to vector<4x16xf32>
    %29 = vector.shape_cast %28 : vector<4x16xf32> to vector<4x16x1xf32>
    %30 = vector.broadcast %29 : vector<4x16x1xf32> to vector<4x16x16xf32>
    %31 = arith.divf %27, %30 : vector<4x16x16xf32>
    "tpu.trace_start"() <{level = 10 : i32, message = "hdm,hnm->hdn"}> : () -> ()
    %cst_11 = arith.constant dense<0.000000e+00> : vector<4x8x16xf32>
    %32 = tpu.matmul %16, %31, %cst_11 {dimension_numbers = #tpu.dot_dimension_numbers<[2], [2], [1], [1], [0, 0, 0, 1, 1, 1], [0], [0]>} : vector<4x8x16xf32>, vector<4x16x16xf32>, vector<4x8x16xf32> -> vector<4x8x16xf32>
    "tpu.trace_stop"() : () -> ()
    %33 = vector.shape_cast %32 : vector<4x8x16xf32> to vector<32x16xf32>
    %34 = tpu.transpose %33, [1, 0] : vector<32x16xf32> -> vector<16x32xf32>
    %c0_12 = arith.constant 0 : index
    %c0_13 = arith.constant 0 : index
    %35 = vector.load %arg5[%c0_12, %c0_13] : memref<32x32xf32, #tpu.memory_space<vmem>>, vector<32x32xf32>
    %cst_14 = arith.constant dense<0.000000e+00> : vector<16x32xf32>
    %36 = tpu.matmul %34, %35, %cst_14 {dimension_numbers = #tpu.dot_dimension_numbers<[1], [0], [0], [1], [0, 0, 1, 1], [], []>} : vector<16x32xf32>, vector<32x32xf32>, vector<16x32xf32> -> vector<16x32xf32>
    %c0_15 = arith.constant 0 : index
    %c0_16 = arith.constant 0 : index
    %37 = vector.load %arg6[%c0_15, %c0_16] : memref<1x32xf32, #tpu.memory_space<vmem>>, vector<1x32xf32>
    %38 = vector.shape_cast %37 : vector<1x32xf32> to vector<32xf32>
    %39 = vector.shape_cast %38 : vector<32xf32> to vector<1x32xf32>
    %40 = vector.broadcast %39 : vector<1x32xf32> to vector<16x32xf32>
    %41 = arith.addf %36, %40 : vector<16x32xf32>
    %c0_17 = arith.constant 0 : index
    %c0_18 = arith.constant 0 : index
    %42 = vector.load %arg7[%c0_17, %c0_18] : memref<16x32xf32, #tpu.memory_space<vmem>>, vector<16x32xf32>
    tpu.vector_store %arg7[%c0_17, %c0_18], %41 {strides = array<i32>} : memref<16x32xf32, #tpu.memory_space<vmem>>, vector<16x32xf32>,
    return
  }
  func.func @transform_0(%arg0: i32) -> (i32, i32) {
    %c0_i32 = arith.constant 0 : i32
    %c0_i32_0 = arith.constant 0 : i32
    %c0_i32_1 = arith.constant 0 : i32
    return %c0_i32, %c0_i32_0 : i32, i32
  }
  func.func @transform_1(%arg0: i32) -> (i32, i32) {
    %c0_i32 = arith.constant 0 : i32
    %c0_i32_0 = arith.constant 0 : i32
    %c0_i32_1 = arith.constant 0 : i32
    return %c0_i32, %c0_i32_0 : i32, i32
  }
  func.func @transform_2(%arg0: i32) -> (i32, i32) {
    %c0_i32 = arith.constant 0 : i32
    %c0_i32_0 = arith.constant 0 : i32
    %c0_i32_1 = arith.constant 0 : i32
    return %c0_i32, %c0_i32_0 : i32, i32
  }
  func.func @transform_3(%arg0: i32) -> (i32, i32) {
    %c0_i32 = arith.constant 0 : i32
    %c0_i32_0 = arith.constant 0 : i32
    %c0_i32_1 = arith.constant 0 : i32
    return %c0_i32, %c0_i32_0 : i32, i32
  }
  func.func @transform_4(%arg0: i32) -> (i32, i32) {
    %c0_i32 = arith.constant 0 : i32
    %c0_i32_0 = arith.constant 0 : i32
    %c0_i32_1 = arith.constant 0 : i32
    return %c0_i32, %c0_i32_0 : i32, i32
  }
  func.func @transform_5(%arg0: i32) -> (i32, i32) {
    %c0_i32 = arith.constant 0 : i32
    %c0_i32_0 = arith.constant 0 : i32
    %c0_i32_1 = arith.constant 0 : i32
    return %c0_i32, %c0_i32_0 : i32, i32
  }
  func.func @transform_6(%arg0: i32) -> (i32, i32) {
    %c0_i32 = arith.constant 0 : i32
    %c0_i32_0 = arith.constant 0 : i32
    %c0_i32_1 = arith.constant 0 : i32
    return %c0_i32, %c0_i32_0 : i32, i32
  }
}

</mosaic_0001>

<bundles_post_ra>
// kernel: multi_headed_attention.1
= control target key start
LH: loop header
LB: loop body
LE: loop exit
PB: predicated region body
PF: predicated region fallthrough
CT: control target
= control target key end

     0   :  { %11 = vsyncpa [#allocation3], 0  ;;  %s1076_s0 = inlined_call_operand.vmem [shape: f32[16,96], index: 0, kind: input, shape index: {}]   ;;  %s1077_s1 = inlined_call_operand.vmem [shape: f32[16,16], index: 1, kind: input, shape index: {}]   ;;  %s1078_s2 = inlined_call_operand.hbm [shape: f32[96,96], index: 2, kind: input, shape index: {}]   ;;  %s1079_s3 = inlined_call_operand.vmem [shape: f32[1,96], index: 3, kind: input, shape index: {}]   ;;  %s1080_s4 = inlined_call_operand.vmem [shape: f32[32,32], index: 4, kind: input, shape index: {}]   ;;  %s1081_s5 = inlined_call_operand.vmem [shape: f32[1,32], index: 5, kind: input, shape index: {}]   ;;  %s1082_s6 = inlined_call_operand.hbm [shape: f32[16,32], index: 6, kind: output, shape index: {}]  }
   0x1   :  { %12 = vsyncpa [#allocation4], 0  ;;  %s21_s23 = sshll.u32 %s1078_s2, 4  ;;  %s887_s24 = smov [#allocation2]   ;;  %s22_s23 = int_to_ptr.hbm [resolvable:$true] %s21_s23 }
   0x2   :  { %s23_s25 = sshll.u32 %s887_s24, 4  ;;  %s888_s26 = smov 128   ;;  %s24_s25 = int_to_ptr.vmem [resolvable:$true] %s23_s25 }
   0x3   :  { %s889_s27 = smov 8  }
   0x4   :  { %29 = dma.hbm_to_vmem [thread:$0]  %s22_s23, 1536, %s24_s25, [#allocation3], %s888_s26, %s888_s26, %s889_s27  }
   0x5   :  { %883 = dma.done.wait [#allocation3], 1536  }
   0x6   :  { %884 = vsyncadd [#allocation3], 4294965760  ;;  %v53_v0 = vld [vmem:[#allocation2 + $0x58] sm:$0xff]  ;;  %v52_v1 = vld [vmem:[#allocation2 + $0x50] sm:$0xff]  ;;  %vm58_vm0 = vcmask 785408   ;;  %vm254_vm1 = vcmask 64512  }
   0x7   :  { %69 = vmatpush.msra.mxu0 %v53_v0  ;;  %v51_v2 = vld [vmem:[#allocation2 + $0x48] sm:$0xff]  ;;  %v50_v3 = vld [vmem:[#allocation2 + $0x40] sm:$0xff]  ;;  %v49_v4 = vld [vmem:[#allocation2 + $0x38] sm:$0xff]  ;;  %vm371_vm2 = vcmask 130048   ;;  %s758_s23 = sshll.u32 %s1082_s6, 4  ;;  %s759_s23 = int_to_ptr.hbm [resolvable:$true] %s758_s23 }
   0x8   :  { %v48_v5 = vld [vmem:[#allocation2 + $0x30] sm:$0xff]  ;;  %v47_v6 = vld [vmem:[#allocation2 + $0x28] sm:$0xff]  ;;  %v46_v7 = vld [vmem:[#allocation2 + $0x20] sm:$0xff] }
   0x9   :  { %70 = vmatpush.msra.mxu0 %v52_v1  ;;  %v45_v8 = vld [vmem:[#allocation2 + $0x18] sm:$0xff]  ;;  %v44_v9 = vld [vmem:[#allocation2 + $0x10] sm:$0xff]  ;;  %v43_v10 = vld [vmem:[#allocation2 + $0x8] sm:$0xff] }
   0xa   :  { %v42_v11 = vld [vmem:[#allocation2] sm:$0xff]  ;;  %v41_v13 = vld [vmem:[%s1076_s0 + $0x8] sm:$0xff] }
   0xb   :  { %71 = vmatpush.msra.mxu0 %v51_v2  ;;  %v40_v12 = vld [vmem:[%s1076_s0] sm:$0xff]  ;;  %v253_v45 = vld [vmem:[%s1077_s1 + $0x8] sm:$0xff] }
   0xc   :  { %v801_v14 = vld [vmem:[%s1079_s3] ss:$0 sm:$0xff] }
   0xd   :  { %72 = vmatpush.msra.mxu0 %v50_v3  ;;  %v252_v39 = vld [vmem:[%s1077_s1] sm:$0xff] }
   0xf   :  { %73 = vmatpush.msra.mxu0 %v49_v4 }
  0x11   :  { %74 = vmatpush.msra.mxu0 %v48_v5 }
  0x13   :  { %75 = vmatpush.msra.mxu0 %v47_v6 }
  0x15   :  { %76 = vmatpush.msra.mxu0 %v46_v7 }
  0x17   :  { %77 = vmatpush.msra.mxu0 %v45_v8 }
  0x19   :  { %78 = vmatpush.msra.mxu0 %v44_v9 }
  0x1b   :  { %79 = vmatpush.msra.mxu0 %v43_v10 }
  0x1d   :  { %80 = vmatpush.msra.mxu0 %v42_v11 }
  0x1e   :  { %771 = vmatmul.msk.f32.vlgmr.msra.gmra.mxu0 %vm58_vm0, %v40_v12 }
  0x26   :  { %772 = vmatmul.msk.f32.gmra.mxu0 %vm58_vm0, %v41_v13 }
  0x9b   :  { %v82_v15 = vpop.f32.mrf.mxu0 }
  0x9c   :  { %v83_v16 = vadd.f32 %v801_v14, %v82_v15 }
  0x9e   :  { %88 = vxpose.xlu0.b32.start [1/2] (short) (narrow) %v83_v16, 96 }
  0xa3   :  { %v85_v17 = vpop.f32.mrf.mxu0 }
  0xa4   :  { %v86_v18 = vadd.f32 %v801_v14, %v85_v17 }
  0xa6   :  { %89 = vxpose.xlu0.b32.end [2/2] (short) (narrow) %v86_v18, 96 }
 0x142   :  { %v104_v19 = vpop.trf.xlu0 }
 0x143   :  { %v120_v20 = vmul.f32 0.35355338, %v104_v19 }
 0x145   :  { %124 = vxpose.xlu1.b32.start.end [1/1] (short) (narrow) %v120_v20, 16 }
 0x14a   :  { %v105_v21 = vpop.trf.xlu0 }
 0x14b   :  { %v121_v22 = vmul.f32 0.35355338, %v105_v21 }
 0x152   :  { %v106_v23 = vpop.trf.xlu0 }
 0x153   :  { %v122_v24 = vmul.f32 0.35355338, %v106_v23 }
 0x155   :  { %156 = vxpose.xlu1.b32.start.end [1/1] (short) (narrow) %v121_v22, 16  ;;  %188 = vxpose.xlu2.b32.start.end [1/1] (short) (narrow) %v122_v24, 16 }
 0x15a   :  { %v107_v25 = vpop.trf.xlu0 }
 0x15b   :  { %v123_v26 = vmul.f32 0.35355338, %v107_v25 }
 0x162   :  { %v108_v27 = vpop.trf.xlu0 }
 0x163   :  { %276 = vmatpush.msra.mxu1 %v108_v27  ;;  %795 = vmatpush.msra.mxu2 %v108_v27 }
 0x165   :  { %220 = vxpose.xlu2.b32.start.end [1/1] (short) (narrow) %v123_v26, 16 }
 0x16a   :  { %v109_v28 = vpop.trf.xlu0 }
 0x16b   :  { %305 = vmatpush.msrb.mxu2 %v109_v28 }
 0x172   :  { %v110_v29 = vpop.trf.xlu0 }
 0x173   :  { %334 = vmatpush.msra.mxu3 %v110_v29 }
 0x17a   :  { %v111_v30 = vpop.trf.xlu0 }
 0x17b   :  { %363 = vmatpush.msrb.mxu1 %v111_v30 }
 0x182   :  { %v966_v1 = vpop.trf.xlu0 }
 0x18a   :  { %v968_v2 = vpop.trf.xlu0 }
 0x192   :  { %v970_v3 = vpop.trf.xlu0 }
 0x19a   :  { %v972_v7 = vpop.trf.xlu0 }
 0x1e9   :  { %v140_v31 = vpop.trf.xlu1 }
 0x1ea   :  { %773 = vmatmul.msk.f32.vlgmr.msra.gmra.mxu1 %vm254_vm1, %v140_v31 }
 0x1ee   :  { %v204_v32 = vpop.trf.xlu2 }
 0x1ef   :  { %777 = vmatmul.msk.f32.vlgmr.msra.gmra.mxu3 %vm254_vm1, %v204_v32 }
 0x1f1   :  { %v141_v33 = vpop.trf.xlu1 }
 0x1f2   :  { %774 = vmatmul.msk.f32.vlgmr.msra.gmra.mxu2 %vm254_vm1, %v141_v33 }
 0x1f6   :  { %v205_v34 = vpop.trf.xlu2 }
 0x1f7   :  { %778 = vmatmul.msk.f32.gmra.mxu3 %vm254_vm1, %v205_v34 }
 0x1f9   :  { %v172_v35 = vpop.trf.xlu1 }
 0x1fa   :  { %775 = vmatmul.msk.f32.vlgmr.msrb.gmra.mxu2 %vm254_vm1, %v172_v35 }
 0x1fe   :  { %v236_v36 = vpop.trf.xlu2 }
 0x1ff   :  { %779 = vmatmul.msk.f32.vlgmr.msrb.gmra.mxu1 %vm254_vm1, %v236_v36 }
 0x201   :  { %v173_v37 = vpop.trf.xlu1 }
 0x202   :  { %776 = vmatmul.msk.f32.gmra.mxu2 %vm254_vm1, %v173_v37 }
 0x206   :  { %v237_v38 = vpop.trf.xlu2 }
 0x207   :  { %780 = vmatmul.msk.f32.gmra.mxu1 %vm254_vm1, %v237_v38 }
 0x267   :  { %v278_v40 = vpop.f32.mrf.mxu1 }
 0x268   :  { %v279_v41 = vadd.f32 %v278_v40, %v252_v39 }
 0x26a   :  { %v372_v42 = vsel %vm371_vm2, %v279_v41, -inf }
 0x26b   :  { %373 = vmax.xlane.f32.xlu2 %v372_v42 }
 0x272   :  { %v336_v43 = vpop.f32.mrf.mxu3 }
 0x273   :  { %v953_v44 = vadd.f32 %v336_v43, %v252_v39 }
 0x275   :  { %v281_v46 = vpop.f32.mrf.mxu2  ;;  %v384_v47 = vsel %vm371_vm2, %v953_v44, -inf }
 0x276   :  { %v282_v48 = vadd.f32 %v281_v46, %v253_v45  ;;  %385 = vmax.xlane.f32.xlu2 %v384_v47 }
 0x278   :  { %v375_v49 = vsel %vm371_vm2, %v282_v48, -inf }
 0x279   :  { %376 = vmax.xlane.f32.xlu0 %v375_v49 }
 0x27a   :  { %v339_v57 = vpop.f32.mrf.mxu3 }
 0x27b   :  { %v340_v58 = vadd.f32 %v339_v57, %v253_v45 }
 0x27c   :  { %v365_v54 = vpop.f32.mrf.mxu1 }
 0x27d   :  { %v307_v50 = vpop.f32.mrf.mxu2  ;;  %v387_v60 = vsel %vm371_vm2, %v340_v58, -inf  ;;  %v366_v63 = vadd.f32 %v365_v54, %v252_v39 }
 0x27e   :  { %v308_v51 = vadd.f32 %v307_v50, %v252_v39 }
 0x27f   :  { %v390_v0 = vsel %vm371_vm2, %v366_v63, -inf }
 0x280   :  { %v378_v52 = vsel %vm371_vm2, %v308_v51, -inf }
 0x281   :  { %379 = vmax.xlane.f32.xlu1 %v378_v52 }
 0x284   :  { %v368_v59 = vpop.f32.mrf.mxu1 }
 0x285   :  { %v310_v53 = vpop.f32.mrf.mxu2  ;;  %v369_v61 = vadd.f32 %v368_v59, %v253_v45 }
 0x286   :  { %v311_v55 = vadd.f32 %v310_v53, %v253_v45 }
 0x287   :  { %v393_v62 = vsel %vm371_vm2, %v369_v61, -inf }
 0x288   :  { %v381_v56 = vsel %vm371_vm2, %v311_v55, -inf }
 0x289   :  { %382 = vmax.xlane.f32.xlu1 %v381_v56 }
 0x291   :  { %388 = vmax.xlane.f32.xlu1 %v387_v60 }
 0x299   :  { %394 = vmax.xlane.f32.xlu1 %v393_v62 }
 0x2a1   :  { %391 = vmax.xlane.f32.xlu1 %v390_v0 }
 0x2de   :  { %v374_v4 = vpop.xlane.xlu2 %373 }
 0x2df   :  { %v396_v5 = vsub.f32 %v279_v41, %v374_v4 }
 0x2e1   :  { %v404_v6 = vmul.f32 1.442695, %v396_v5 }
 0x2e3   :  { %803 = vpow2.f32 %v404_v6 }
 0x2e9   :  { %v974_v8 = vpop.eup %803  ;;  %v386_v23 = vpop.xlane.xlu2 %385 }
 0x2ea   :  { %v420_v9 = vsel %vm371_vm2, %v974_v8, 0.0  ;;  %v400_v27 = vsub.f32 %v953_v44, %v386_v23 }
 0x2eb   :  { %421 = vadd.xlane.f32.xlu2 %v420_v9 }
 0x2ec   :  { %v377_v10 = vpop.xlane.xlu0 %376  ;;  %v412_v30 = vmul.f32 1.442695, %v400_v27 }
 0x2ed   :  { %v397_v11 = vsub.f32 %v282_v48, %v377_v10 }
 0x2ef   :  { %v406_v12 = vmul.f32 1.442695, %v397_v11 }
 0x2f1   :  { %805 = vpow2.f32 %v406_v12 }
 0x2f4   :  { %v380_v13 = vpop.xlane.xlu1 %379 }
 0x2f5   :  { %v398_v14 = vsub.f32 %v308_v51, %v380_v13 }
 0x2f7   :  { %v978_v15 = vpop.eup %805  ;;  %v408_v16 = vmul.f32 1.442695, %v398_v14 }
 0x2f8   :  { %v423_v17 = vsel %vm371_vm2, %v978_v15, 0.0 }
 0x2f9   :  { %807 = vpow2.f32 %v408_v16  ;;  %424 = vadd.xlane.f32.xlu2 %v423_v17 }
 0x2fc   :  { %v383_v18 = vpop.xlane.xlu1 %382 }
 0x2fd   :  { %v399_v19 = vsub.f32 %v311_v55, %v383_v18 }
 0x2ff   :  { %v982_v20 = vpop.eup %807  ;;  %v410_v21 = vmul.f32 1.442695, %v399_v19 }
 0x300   :  { %v426_v22 = vsel %vm371_vm2, %v982_v20, 0.0 }
 0x301   :  { %809 = vpow2.f32 %v410_v21  ;;  %427 = vadd.xlane.f32.xlu1 %v426_v22 }
 0x304   :  { %v389_v24 = vpop.xlane.xlu1 %388 }
 0x305   :  { %v401_v25 = vsub.f32 %v340_v58, %v389_v24 }
 0x307   :  { %v986_v26 = vpop.eup %809  ;;  %v414_v28 = vmul.f32 1.442695, %v401_v25 }
 0x308   :  { %v429_v29 = vsel %vm371_vm2, %v986_v26, 0.0 }
 0x309   :  { %811 = vpow2.f32 %v414_v28  ;;  %430 = vadd.xlane.f32.xlu1 %v429_v29 }
 0x30a   :  { %813 = vpow2.f32 %v412_v30 }
 0x30c   :  { %v395_v31 = vpop.xlane.xlu1 %394 }
 0x30d   :  { %v403_v32 = vsub.f32 %v369_v61, %v395_v31 }
 0x30f   :  { %v991_v33 = vpop.eup %811  ;;  %v418_v34 = vmul.f32 1.442695, %v403_v32 }
 0x310   :  { %v435_v35 = vsel %vm371_vm2, %v991_v33, 0.0  ;;  %v995_v37 = vpop.eup %813 }
 0x311   :  { %815 = vpow2.f32 %v418_v34  ;;  %436 = vadd.xlane.f32.xlu2 %v435_v35  ;;  %v432_v42 = vsel %vm371_vm2, %v995_v37, 0.0 }
 0x314   :  { %v392_v36 = vpop.xlane.xlu1 %391 }
 0x315   :  { %v402_v38 = vsub.f32 %v366_v63, %v392_v36 }
 0x317   :  { %v997_v39 = vpop.eup %815  ;;  %v416_v40 = vmul.f32 1.442695, %v402_v38 }
 0x318   :  { %v441_v41 = vsel %vm371_vm2, %v997_v39, 0.0 }
 0x319   :  { %817 = vpow2.f32 %v416_v40  ;;  %442 = vadd.xlane.f32.xlu1 %v441_v41  ;;  %433 = vadd.xlane.f32.xlu2 %v432_v42 }
 0x31f   :  { %v1003_v43 = vpop.eup %817 }
 0x320   :  { %v438_v44 = vsel %vm371_vm2, %v1003_v43, 0.0 }
 0x321   :  { %439 = vadd.xlane.f32.xlu1 %v438_v44 }
 0x35e   :  { %v422_v45 = vpop.xlane.xlu2 %421 }
 0x35f   :  { %819 = vrcp.f32 %v422_v45  ;;  %vm449_vm5 = vweird.f32 %v422_v45  ;;  %v455_v59 = vand.u32 2147483648, %v422_v45  ;;  %v453_v61 = vand.u32 2147483647, %v422_v45 }
 0x361   :  { %v456_v9 = vor.u32 1.1754944e-38, %v455_v59  ;;  %vm454_vm10 = vcmp.eq.f32.partialorder %v453_v61, 8.507059e+37 }
 0x365   :  { %v820_v46 = vpop.eup %819 }
 0x366   :  { %v445_v47 = vmul.f32 %v820_v46, %v422_v45  ;;  %vm450_vm3 = vweird.f32 %v820_v46 }
 0x367   :  { %vm1010_vm6 = vmor %vm449_vm5, %vm450_vm3 }
 0x368   :  { %v446_v49 = vsub.f32 1.0, %v445_v47 }
 0x36a   :  { %v447_v51 = vmul.f32 %v820_v46, %v446_v49 }
 0x36c   :  { %v425_v48 = vpop.xlane.xlu2 %424  ;;  %v448_v56 = vadd.f32 %v820_v46, %v447_v51 }
 0x36d   :  { %821 = vrcp.f32 %v425_v48  ;;  %v470_v55 = vand.u32 2147483648, %v425_v48  ;;  %v468_v58 = vand.u32 2147483647, %v425_v48  ;;  %vm464_vm7 = vweird.f32 %v425_v48 }
 0x36e   :  { %v452_v6 = vsel %vm1010_vm6, %v820_v46, %v448_v56 }
 0x36f   :  { %v471_v0 = vor.u32 1.1754944e-38, %v470_v55  ;;  %vm469_vm9 = vcmp.eq.f32.partialorder %v468_v58, 8.507059e+37  ;;  %v457_v13 = vsel %vm454_vm10, %v456_v9, %v452_v6 }
 0x370   :  { %v458_v16 = vmul.f32 %v974_v8, %v457_v13 }
 0x373   :  { %v822_v50 = vpop.eup %821 }
 0x374   :  { %v460_v52 = vmul.f32 %v822_v50, %v425_v48  ;;  %v1007_v53 = vpop.xlane.xlu1 %427  ;;  %vm465_vm4 = vweird.f32 %v822_v50 }
 0x375   :  { %823 = vrcp.f32 %v1007_v53  ;;  %vm466_vm8 = vmor %vm464_vm7, %vm465_vm4  ;;  %v485_v28 = vand.u32 2147483648, %v1007_v53  ;;  %v483_v30 = vand.u32 2147483647, %v1007_v53  ;;  %vm479_vm15 = vweird.f32 %v1007_v53 }
 0x376   :  { %v461_v54 = vsub.f32 1.0, %v460_v52 }
 0x377   :  { %v486_v40 = vor.u32 1.1754944e-38, %v485_v28  ;;  %vm484_vm3 = vcmp.eq.f32.partialorder %v483_v30, 8.507059e+37 }
 0x378   :  { %v462_v57 = vmul.f32 %v822_v50, %v461_v54 }
 0x37a   :  { %v463_v62 = vadd.f32 %v822_v50, %v462_v57 }
 0x37b   :  { %v824_v63 = vpop.eup %823 }
 0x37c   :  { %v467_v4 = vsel %vm466_vm8, %v822_v50, %v463_v62  ;;  %v431_v5 = vpop.xlane.xlu1 %430  ;;  %v475_v11 = vmul.f32 %v824_v63, %v1007_v53  ;;  %vm480_vm12 = vweird.f32 %v824_v63 }
 0x37d   :  { %v472_v10 = vsel %vm469_vm9, %v471_v0, %v467_v4  ;;  %825 = vrcp.f32 %v431_v5  ;;  %vm494_vm13 = vweird.f32 %v431_v5  ;;  %v498_v25 = vand.u32 2147483647, %v431_v5  ;;  %vm481_vm0 = vmor %vm479_vm15, %vm480_vm12 }
 0x37e   :  { %v473_v12 = vmul.f32 %v978_v15, %v472_v10  ;;  %v476_v14 = vsub.f32 1.0, %v475_v11  ;;  %v500_v15 = vand.u32 2147483648, %v431_v5 }
 0x37f   :  { %vm499_vm1 = vcmp.eq.f32.partialorder %v498_v25, 8.507059e+37  ;;  %v715_v25 = vld [vmem:[%s1080_s4 + $0x18] sm:$0xff] }
 0x380   :  { %781 = vmatpush.xpose.msk.msra.mxu2 %vm371_vm2, %v473_v12  ;;  %v477_v21 = vmul.f32 %v824_v63, %v476_v14  ;;  %v501_v35 = vor.u32 1.1754944e-38, %v500_v15  ;;  %739 = vmatpush.msra.mxu1 %v715_v25 }
 0x382   :  { %v478_v27 = vadd.f32 %v824_v63, %v477_v21 }
 0x383   :  { %v826_v17 = vpop.eup %825 }
 0x384   :  { %v490_v18 = vmul.f32 %v826_v17, %v431_v5  ;;  %782 = vmatpush.xpose.msk.msra.mxu2 %vm371_vm2, %v458_v16  ;;  %v437_v19 = vpop.xlane.xlu2 %436  ;;  %vm495_vm11 = vweird.f32 %v826_v17  ;;  %v482_v38 = vsel %vm481_vm0, %v824_v63, %v478_v27  ;;  %v714_v27 = vld [vmem:[%s1080_s4 + $0x10] sm:$0xff] }
 0x385   :  { %827 = vrcp.f32 %v437_v19  ;;  %vm1024_vm14 = vmor %vm494_vm13, %vm495_vm11  ;;  %v530_v41 = vand.u32 2147483648, %v437_v19  ;;  %v528_v45 = vand.u32 2147483647, %v437_v19  ;;  %v487_v47 = vsel %vm484_vm3, %v486_v40, %v482_v38  ;;  %740 = vmatpush.msra.mxu1 %v714_v27 }
 0x386   :  { %v491_v22 = vsub.f32 1.0, %v490_v18  ;;  %vm524_vm5 = vweird.f32 %v437_v19  ;;  %v488_v54 = vmul.f32 %v982_v20, %v487_v47 }
 0x387   :  { %783 = vmatmul.msk.f32.vlgmr.msra.gmra.mxu2 %vm371_vm2, %v966_v1  ;;  %v531_v50 = vor.u32 1.1754944e-38, %v530_v41  ;;  %vm529_vm7 = vcmp.eq.f32.partialorder %v528_v45, 8.507059e+37 }
 0x388   :  { %v492_v23 = vmul.f32 %v826_v17, %v491_v22 }
 0x38a   :  { %v493_v24 = vadd.f32 %v826_v17, %v492_v23 }
 0x38b   :  { %v828_v8 = vpop.eup %827 }
 0x38c   :  { %v520_v1 = vmul.f32 %v828_v8, %v437_v19  ;;  %v443_v31 = vpop.xlane.xlu1 %442  ;;  %v434_v32 = vpop.xlane.xlu2 %433  ;;  %v497_v34 = vsel %vm1024_vm14, %v826_v17, %v493_v24  ;;  %vm525_vm4 = vweird.f32 %v828_v8 }
 0x38d   :  { %829 = vrcp.f32 %v443_v31  ;;  %v502_v42 = vsel %vm499_vm1, %v501_v35, %v497_v34  ;;  %vm526_vm6 = vmor %vm524_vm5, %vm525_vm4  ;;  %v558_v62 = vand.u32 2147483647, %v443_v31  ;;  %v515_v63 = vand.u32 2147483648, %v434_v32 }
 0x38e   :  { %v521_v36 = vsub.f32 1.0, %v520_v1  ;;  %831 = vrcp.f32 %v434_v32  ;;  %v503_v46 = vmul.f32 %v986_v26, %v502_v42  ;;  %v560_v26 = vand.u32 2147483648, %v443_v31  ;;  %v802_v1 = vld [vmem:[%s1081_s5] ss:$0 sm:$0xff] }
 0x38f   :  { %v513_v4 = vand.u32 2147483647, %v434_v32  ;;  %vm554_vm10 = vweird.f32 %v443_v31  ;;  %vm509_vm12 = vweird.f32 %v434_v32  ;;  %vm559_vm13 = vcmp.eq.f32.partialorder %v558_v62, 8.507059e+37 }
 0x390   :  { %v522_v44 = vmul.f32 %v828_v8, %v521_v36  ;;  %784 = vmatpush.xpose.msk.msrb.mxu3 %vm371_vm2, %v503_v46  ;;  %v561_v6 = vor.u32 1.1754944e-38, %v560_v26  ;;  %v516_v10 = vor.u32 1.1754944e-38, %v515_v63 }
 0x391   :  { %vm514_vm15 = vcmp.eq.f32.partialorder %v513_v4, 8.507059e+37 }
 0x392   :  { %v523_v48 = vadd.f32 %v828_v8, %v522_v44 }
 0x393   :  { %v830_v49 = vpop.eup %829 }
 0x394   :  { %v832_v51 = vpop.eup %831  ;;  %v527_v52 = vsel %vm526_vm6, %v828_v8, %v523_v48  ;;  %v550_v53 = vmul.f32 %v830_v49, %v443_v31  ;;  %v440_v55 = vpop.xlane.xlu1 %439  ;;  %785 = vmatpush.xpose.msk.msrb.mxu3 %vm371_vm2, %v488_v54  ;;  %vm555_vm8 = vweird.f32 %v830_v49 }
 0x395   :  { %v532_v56 = vsel %vm529_vm7, %v531_v50, %v527_v52  ;;  %v505_v57 = vmul.f32 %v832_v51, %v434_v32  ;;  %833 = vrcp.f32 %v440_v55  ;;  %vm510_vm9 = vweird.f32 %v832_v51  ;;  %vm556_vm11 = vmor %vm554_vm10, %vm555_vm8 }
 0x396   :  { %v551_v58 = vsub.f32 1.0, %v550_v53  ;;  %v533_v60 = vmul.f32 %v991_v33, %v532_v56  ;;  %vm511_vm14 = vmor %vm509_vm12, %vm510_vm9  ;;  %v545_v17 = vand.u32 2147483648, %v440_v55  ;;  %v543_v21 = vand.u32 2147483647, %v440_v55 }
 0x397   :  { %v506_v59 = vsub.f32 1.0, %v505_v57  ;;  %786 = vmatmul.msk.f32.vlgmr.msrb.gmra.mxu3 %vm371_vm2, %v968_v2  ;;  %vm539_vm1 = vweird.f32 %v440_v55 }
 0x398   :  { %v552_v61 = vmul.f32 %v830_v49, %v551_v58  ;;  %787 = vmatpush.xpose.msk.msrb.mxu2 %vm371_vm2, %v533_v60  ;;  %v546_v23 = vor.u32 1.1754944e-38, %v545_v17  ;;  %vm544_vm4 = vcmp.eq.f32.partialorder %v543_v21, 8.507059e+37 }
 0x399   :  { %v507_v0 = vmul.f32 %v832_v51, %v506_v59 }
 0x39a   :  { %v553_v20 = vadd.f32 %v830_v49, %v552_v61 }
 0x39b   :  { %v834_v5 = vpop.eup %833  ;;  %v508_v9 = vadd.f32 %v832_v51, %v507_v0 }
 0x39c   :  { %v557_v33 = vsel %vm556_vm11, %v830_v49, %v553_v20  ;;  %v535_v11 = vmul.f32 %v834_v5, %v440_v55  ;;  %vm540_vm0 = vweird.f32 %v834_v5 }
 0x39d   :  { %v562_v12 = vsel %vm559_vm13, %v561_v6, %v557_v33  ;;  %v512_v13 = vsel %vm511_vm14, %v832_v51, %v508_v9  ;;  %vm541_vm3 = vmor %vm539_vm1, %vm540_vm0 }
 0x39e   :  { %v536_v14 = vsub.f32 1.0, %v535_v11  ;;  %v517_v16 = vsel %vm514_vm15, %v516_v10, %v512_v13  ;;  %v563_v2 = vmul.f32 %v997_v39, %v562_v12 }
 0x39f   :  { %v518_v18 = vmul.f32 %v995_v37, %v517_v16 }
 0x3a0   :  { %v537_v19 = vmul.f32 %v834_v5, %v536_v14  ;;  %790 = vmatpush.xpose.msk.msra.mxu3 %vm371_vm2, %v563_v2 }
 0x3a1   :  { %788 = vmatpush.xpose.msk.msrb.mxu2 %vm371_vm2, %v518_v18 }
 0x3a2   :  { %v538_v22 = vadd.f32 %v834_v5, %v537_v19 }
 0x3a4   :  { %v542_v15 = vsel %vm541_vm3, %v834_v5, %v538_v22  ;;  %789 = vmatmul.msk.f32.vlgmr.msrb.gmra.mxu2 %vm371_vm2, %v970_v3  ;;  %v713_v3 = vld [vmem:[%s1080_s4 + $0x8] sm:$0xff] }
 0x3a5   :  { %v547_v39 = vsel %vm544_vm4, %v546_v23, %v542_v15  ;;  %741 = vmatpush.msra.mxu1 %v713_v3 }
 0x3a6   :  { %v548_v24 = vmul.f32 %v1003_v43, %v547_v39 }
 0x3a8   :  { %791 = vmatpush.xpose.msk.msra.mxu3 %vm371_vm2, %v548_v24 }
 0x3ab   :  { %792 = vmatmul.msk.f32.vlgmr.msra.gmra.mxu3 %vm371_vm2, %v972_v7  ;;  %v712_v7 = vld [vmem:[%s1080_s4] sm:$0xff]  ;;  %vm720_vm2 = vcmask 261120   ;;  %s890_s4 = smov [#allocation5]  }
 0x3ac   :  { %742 = vmatpush.msra.mxu1 %v712_v7  ;;  %s756_s20 = sshll.u32 %s890_s4, 4  ;;  %s757_s20 = int_to_ptr.vmem [resolvable:$true] %s756_s20 }
 0x40a   :  { %v590_v37 = vpop.f32.mrf.mxu2 }
 0x40b   :  { %680 = vxpose.xlu2.b32.start [1/4] (short) (narrow) %v590_v37, 16 }
 0x41a   :  { %v619_v43 = vpop.f32.mrf.mxu3 }
 0x41b   :  { %681 = vxpose.xlu2.b32.cont [2/4] (short) (narrow) %v619_v43, 16 }
 0x427   :  { %v648_v8 = vpop.f32.mrf.mxu2 }
 0x428   :  { %682 = vxpose.xlu2.b32.cont [3/4] (short) (narrow) %v648_v8, 16 }
 0x42e   :  { %v677_v28 = vpop.f32.mrf.mxu3 }
 0x430   :  { %683 = vxpose.xlu2.b32.end [4/4] (short) (narrow) %v677_v28, 16 }
 0x4b1   :  { %v696_v29 = vpop.trf.xlu2 }
 0x4b2   :  { %793 = vmatmul.msk.f32.vlgmr.msra.gmra.mxu1 %vm720_vm2, %v696_v29 }
 0x4b9   :  { %v697_v30 = vpop.trf.xlu2 }
 0x4ba   :  { %794 = vmatmul.msk.f32.gmra.mxu1 %vm720_vm2, %v697_v30 }
 0x52f   :  { %v744_v31 = vpop.f32.mrf.mxu1 }
 0x530   :  { %v745_v32 = vadd.f32 %v802_v1, %v744_v31 }
 0x532   :  { %750 = vst.msk [vmem:[#allocation5] sm:$0xff] %vm720_vm2, %v745_v32 }
 0x537   :  { %v747_v34 = vpop.f32.mrf.mxu1 }
 0x538   :  { %v748_v35 = vadd.f32 %v802_v1, %v747_v34 }
 0x53a   :  { %751 = vst.msk [vmem:[#allocation5 + $0x8] sm:$0xff] %vm720_vm2, %v748_v35 }
 0x53b   :  { %764 = dma.vmem_to_hbm [thread:$0]  %s757_s20, 256, %s759_s23, [#allocation4], %s888_s26, %s888_s26, %s889_s27  }
 0x53c   :  { %885 = dma.done.wait [#allocation4], 256  }
 0x53d   :  { %886 = vsyncadd [#allocation4], 4294967040 }
 0x53e   :  { %769 = vsyncpa [#allocation3], 1 }
 0x53f   :  { %770 = vsyncpa [#allocation4], 1 }

</bundles_post_ra>
